<compile_context>
chip_gen: v7x
topology: tpu7x:2x2x1
jax: 0.10.0
libtpu: 0.0.40
codegen_flags: <defaults>
</compile_context>

<pallas_src>
import jax
import jax.numpy as jnp
from jax import lax
from jax.experimental import pallas as pl
from jax.experimental.pallas import tpu as pltpu

_KP = 16  # 9 conv taps zero-padded to 16 for a friendlier MXU contraction dim


def head_kernel(p_ref, w_ref, b_ref, o_ref):
    """One (batch, token-tile) grid step.

    p_ref : (1, TN, KP)  im2col patches (taps 0..8 real, 9..15 zero)
    w_ref : (KP, C)      conv taps as matmul weights (grid-invariant, resident)
    b_ref : (1, C)       conv bias (grid-invariant, resident)
    o_ref : (1, TN, C)   output tokens, C on the lane axis (lane-dense writes)
    """
    acc = jnp.dot(p_ref[0], w_ref[...], preferred_element_type=jnp.float32)
    o_ref[0] = (acc + b_ref[...]).astype(o_ref.dtype)


def _rows_per_tile(H, W, target_tokens=2048):
    """Rows of the image per grid step: largest divisor of H with
    rows*W <= target_tokens and rows*W a multiple of 8 (sublane alignment)."""
    best = None
    for r in range(1, H + 1):
        if H % r == 0 and r * W <= target_tokens and (r * W) % 8 == 0:
            best = r
    if best is None:
        best = H  # fallback: one tile per batch element (block == full dim)
    return best


def _vmem_limit_bytes(TN, KP, C):
    """Per-step VMEM from the actual tile math (double-buffered in/out +
    resident weights/bias), 2x margin, floored at 8 MiB, capped at 64 MiB."""
    pad_lane = lambda d: -(-d // 128) * 128
    pad_sub = lambda d: -(-d // 8) * 8
    used = (
        2 * pad_sub(TN) * pad_lane(KP) * 4    # double-buffered patch tiles
        + 2 * pad_sub(TN) * pad_lane(C) * 4   # double-buffered output tiles
        + pad_sub(KP) * pad_lane(C) * 4       # resident weights
        + pad_sub(1) * pad_lane(C) * 4        # resident bias
    )
    return int(min(max(2 * used + (1 << 20), 8 << 20), 64 << 20))


def head_pallas(x, conv_weight, conv_bias, *, target_tokens=2048):
    """Pallas port of Head.forward.

    x           : (B, 1, H, W)
    conv_weight : (embed_dim, 1, 3, 3)   (torch Conv2d layout, cross-correlation)
    conv_bias   : (embed_dim,)
    returns (tokens, H, W) with tokens : (B, H*W, embed_dim)
    """
    B, Cin, H, W = x.shape
    assert Cin == 1, "Head uses a single-input-channel conv"
    C = conv_weight.shape[0]
    N = H * W
    out_dtype = x.dtype

    # --- im2col in the wrapper (cheap: single input channel).  tap k = dy*3+dx,
    #     zero padding == conv padding = 1.  patches: (B, N, KP) f32. ---
    xp = jnp.pad(x[:, 0].astype(jnp.float32), ((0, 0), (1, 1), (1, 1)))
    taps = [xp[:, dy:dy + H, dx:dx + W] for dy in range(3) for dx in range(3)]
    patches = jnp.stack(taps, axis=-1).reshape(B, N, 9)
    patches = jnp.pad(patches, ((0, 0), (0, 0), (0, _KP - 9)))

    # --- weights: (C, 1, 3, 3) -> (KP, C), rows 9..15 zero; bias -> (1, C). ---
    w9 = conv_weight.reshape(C, 9).astype(jnp.float32).T           # (9, C)
    w_pad = jnp.pad(w9, ((0, _KP - 9), (0, 0)))                    # (KP, C)
    b2 = conv_bias.reshape(1, C).astype(jnp.float32)               # (1, C)

    TR = _rows_per_tile(H, W, target_tokens)
    TN = TR * W
    n_tiles = N // TN

    tokens = pl.pallas_call(
        head_kernel,
        out_shape=jax.ShapeDtypeStruct((B, N, C), out_dtype),
        grid_spec=pltpu.PrefetchScalarGridSpec(
            num_scalar_prefetch=0,
            grid=(B, n_tiles),
            in_specs=[
                pl.BlockSpec((1, TN, _KP), lambda b, j: (b, j, 0)),
                pl.BlockSpec((_KP, C), lambda b, j: (0, 0)),
                pl.BlockSpec((1, C), lambda b, j: (0, 0)),
            ],
            out_specs=pl.BlockSpec((1, TN, C), lambda b, j: (b, j, 0)),
        ),
        compiler_params=pltpu.CompilerParams(
            dimension_semantics=("parallel", "parallel"),
            vmem_limit_bytes=_vmem_limit_bytes(TN, _KP, C),
        ),
    )(patches, w_pad, b2)
    return tokens, H, W


def head_reference(x, conv_weight, conv_bias):
    """Pure-JAX reference mirroring torch's Conv2d + flatten(2).transpose(1, 2)."""
    y = lax.conv_general_dilated(
        x, conv_weight, window_strides=(1, 1), padding=((1, 1), (1, 1)),
        dimension_numbers=("NCHW", "OIHW", "NCHW"),
        precision=lax.Precision.HIGHEST)
    y = y + conv_bias[None, :, None, None]
    B, C, H, W = y.shape
    return y.reshape(B, C, H * W).transpose(0, 2, 1), H, W


if __name__ == "__main__":
    # Small shapes consistent with the module: x is (B, 1, H, W), single channel.
    # embed_dim = 128 keeps the output last dim lane-dense (multiple of 128).
    B, H, W = 2, 16, 16
    embed_dim = 128

    key = jax.random.PRNGKey(0)
    kx, kw, kb = jax.random.split(key, 3)
    x = jax.random.normal(kx, (B, 1, H, W), jnp.float32)
    conv_weight = jax.random.normal(kw, (embed_dim, 1, 3, 3), jnp.float32) * 0.1
    conv_bias = jax.random.normal(kb, (embed_dim,), jnp.float32) * 0.05

    tokens, Ho, Wo = head_pallas(x, conv_weight, conv_bias)
    tokens = jax.block_until_ready(tokens)

    ref, _, _ = head_reference(x, conv_weight, conv_bias)
    assert tokens.shape == (B, H * W, embed_dim)
    assert (Ho, Wo) == (H, W)
    max_err = jnp.max(jnp.abs(tokens - ref))
    # Kernel matmul is f32 on the MXU (multi-pass); allow a small slack vs the
    # HIGHEST-precision XLA reference.
    assert jnp.allclose(tokens, ref, atol=1e-4, rtol=1e-4), f"max abs err {max_err}"

    print("KERNEL_OK")
</pallas_src>

<mosaic_0001>
module attributes {stable_mosaic.version = 11 : i64} {
  func.func @head_kernel(%arg0: i32, %arg1: i32, %arg2: memref<1x256x16xf32, #tpu.memory_space<vmem>>, %arg3: memref<16x128xf32, #tpu.memory_space<vmem>>, %arg4: memref<1x128xf32, #tpu.memory_space<vmem>>, %arg5: memref<1x256x128xf32, #tpu.memory_space<vmem>>) attributes {dimension_semantics = [#tpu.dimension_semantics<parallel>, #tpu.dimension_semantics<parallel>], iteration_bounds = array<i64: 2, 1>, scalar_prefetch = 0 : i64, scratch_operands = 0 : i64, tpu.core_type = #tpu.core_type<tc>, window_params = [{transform_indices = @transform_0, window_bounds = array<i64: 1, 256, 16>}, {pipeline_mode = #tpu.pipeline_mode<synchronous>, transform_indices = @transform_1, window_bounds = array<i64: 16, 128>}, {pipeline_mode = #tpu.pipeline_mode<synchronous>, transform_indices = @transform_2, window_bounds = array<i64: 1, 128>}, {transform_indices = @transform_3, window_bounds = array<i64: 1, 256, 128>}]} {
    %c0 = arith.constant 0 : index
    %c0_0 = arith.constant 0 : index
    %c0_1 = arith.constant 0 : index
    %0 = vector.load %arg2[%c0, %c0_0, %c0_1] : memref<1x256x16xf32, #tpu.memory_space<vmem>>, vector<1x256x16xf32>
    %1 = vector.shape_cast %0 : vector<1x256x16xf32> to vector<256x16xf32>
    %c0_2 = arith.constant 0 : index
    %c0_3 = arith.constant 0 : index
    %2 = vector.load %arg3[%c0_2, %c0_3] : memref<16x128xf32, #tpu.memory_space<vmem>>, vector<16x128xf32>
    %cst = arith.constant dense<0.000000e+00> : vector<256x128xf32>
    %3 = tpu.matmul %1, %2, %cst {dimension_numbers = #tpu.dot_dimension_numbers<[1], [0], [0], [1], [0, 0, 1, 1], [], []>} : vector<256x16xf32>, vector<16x128xf32>, vector<256x128xf32> -> vector<256x128xf32>
    %c0_4 = arith.constant 0 : index
    %c0_5 = arith.constant 0 : index
    %4 = vector.load %arg4[%c0_4, %c0_5] : memref<1x128xf32, #tpu.memory_space<vmem>>, vector<1x128xf32>
    %5 = vector.broadcast %4 : vector<1x128xf32> to vector<256x128xf32>
    %6 = arith.addf %3, %5 : vector<256x128xf32>
    %c0_6 = arith.constant 0 : index
    %c0_7 = arith.constant 0 : index
    %c0_8 = arith.constant 0 : index
    %7 = vector.load %arg5[%c0_6, %c0_7, %c0_8] : memref<1x256x128xf32, #tpu.memory_space<vmem>>, vector<1x256x128xf32>
    %8 = vector.shape_cast %7 : vector<1x256x128xf32> to vector<256x128xf32>
    %9 = vector.shape_cast %6 : vector<256x128xf32> to vector<1x256x128xf32>
    tpu.vector_store %arg5[%c0_6, %c0_7, %c0_8], %9 {strides = array<i32>} : memref<1x256x128xf32, #tpu.memory_space<vmem>>, vector<1x256x128xf32>,
    return
  }
  func.func @transform_0(%arg0: i32, %arg1: i32) -> (i32, i32, i32) {
    %c0_i32 = arith.constant 0 : i32
    %c0_i32_0 = arith.constant 0 : i32
    return %arg0, %arg1, %c0_i32 : i32, i32, i32
  }
  func.func @transform_1(%arg0: i32, %arg1: i32) -> (i32, i32) {
    %c0_i32 = arith.constant 0 : i32
    %c0_i32_0 = arith.constant 0 : i32
    %c0_i32_1 = arith.constant 0 : i32
    return %c0_i32, %c0_i32_0 : i32, i32
  }
  func.func @transform_2(%arg0: i32, %arg1: i32) -> (i32, i32) {
    %c0_i32 = arith.constant 0 : i32
    %c0_i32_0 = arith.constant 0 : i32
    %c0_i32_1 = arith.constant 0 : i32
    return %c0_i32, %c0_i32_0 : i32, i32
  }
  func.func @transform_3(%arg0: i32, %arg1: i32) -> (i32, i32, i32) {
    %c0_i32 = arith.constant 0 : i32
    %c0_i32_0 = arith.constant 0 : i32
    return %arg0, %arg1, %c0_i32 : i32, i32, i32
  }
}

</mosaic_0001>

<bundles_post_ra>
// kernel: tpu_custom_call.1
= control target key start
LH: loop header
LB: loop body
LE: loop exit
PB: predicated region body
PF: predicated region fallthrough
CT: control target
= control target key end

     0   :  { %8 = vsyncpa [#allocation3], 0  ;;  %s1253_s0 = inlined_call_operand.vmem [shape: f32[2,256,16], index: 0, kind: input, shape index: {}]   ;;  %s1254_s1 = inlined_call_operand.vmem [shape: f32[16,128], index: 1, kind: input, shape index: {}]   ;;  %s1255_s2 = inlined_call_operand.vmem [shape: f32[1,128], index: 2, kind: input, shape index: {}]   ;;  %s1256_s3 = inlined_call_operand.hbm [shape: f32[2,256,128], index: 3, kind: output, shape index: {}]  }
   0x1   :  { %10 = vsyncpa [#allocation3 + $0x1], 0  ;;  %s990_s12 = smov 0   ;;  %s992_s13 = smov 0  }
   0x2   :  { %s994_s14 = smov 0   ;;  %s996_s15 = smov 0  }
   0x3   :  { %s998_s16 = smov 0   ;;  %s1000_s17 = smov 0  }
   0x4 LB: > { %s690_s18 = sadd.s32 4294967295, %s965_s17   ;;  %s691_s19 = sadd.s32 4294967294, %s965_s17   ;;  %s965_s17 = sphi %s1000_s17, %s16_s17   ;;  %s961_s16 = sphi %s998_s16, %s1263_s16   ;;  %s957_s15 = sphi %s996_s15, %s1262_s15   ;;  %s953_s14 = sphi %s994_s14, %s1261_s14   ;;  %s949_s13 = sphi %s992_s13, %s1260_s13   ;;  %s945_s12 = sphi %s990_s12, %s1259_s12  }
   0x5   : > { %s28_s20 = sadd.s32 1, %s961_s16  ;;  %s107_s21 = sadd.s32 1, %s953_s14 }
   0x6   : > { %p30_p0 = scmp.ge.s32.totalorder %s28_s20, 2  ;;  %p117_p1 = scmp.ne.s32.totalorder %s953_s14, %s949_s13 }
   0x7   : > { %p118_p2 = scmp.eq.s32.totalorder %s690_s18, 1  ;;  %p123_p3 = scmp.ne.s32.totalorder %s949_s13, %s945_s12 }
   0x8   : > { %s1265_s20 = smov (%p30_p0, %s28_s20), 0  ;;  %p124_p5 = scmp.eq.s32.totalorder %s691_s19, 1 }
   0x9   : > { %p1030_p4 = por %p118_p2, %p117_p1  ;;  %s102_s23 = ssub.s32 %s961_s16, %s1265_s20 }
   0xa   : > { %p694_p6 = scmp.ge.s32.totalorder %s965_s17, 1  ;;  %p105_p7 = scmp.eq.s32.totalorder %s102_s23, 0 }
   0xb   : > { %p1037_p8 = por %p124_p5, %p123_p3  ;;  %p161_p9 = scmp.lt.s32.totalorder %s965_s17, 3 }
   0xc   : > { %s1043_s25 = scalar_select %p105_p7, %s953_s14, %s107_s21  }
   0xd   : > { %p162_p10 = pnand %p694_p6, %p161_p9 }
   0xe   : > { %v232_v0 = vld [vmem:[%s1254_s1] sm:$0xff] (!%p162_p10)  ;;  %v233_v1 = vld [vmem:[%s1254_s1 + $0x8] sm:$0xff] (!%p162_p10)  ;;  %p190_p11 = scmp.lt.s32.totalorder (!%p162_p10), %s957_s15, 1  ;;  %vm241_vm0 = vcmask (!%p162_p10), 130048   ;;  %s186_s8 = sand.u32 (!%p162_p10), 1, %s949_s13  }
   0xf   : > { %165 = sbr.rel (%p162_p10) target bundleno = 287 (0x11f), region = 32  ;;  %v824_v2 = vpack.c.bf16 (!%p162_p10), %v233_v1, %v232_v0  ;;  %s695_s9 = sshll.u32 (!%p162_p10), %s186_s8, 8  ;;  %v1128_v35 = vld [vmem:[%s1255_s2] ss:$0 sm:$0xff] (!%p162_p10) }
  0x10   : > { %s1134_s18 = scalar_lea.vmem (!%p162_p10), [#allocation2], %s695_s9  ;;  %s737_s19 = sshll.u32 (!%p162_p10), %s957_s15, 12 }
  0x11   : > { %825 = vmatprep.subr.bf16.mxu0 (!%p162_p10), %v824_v2  ;;  %828 = vmatprep.subr.bf16.mxu1 (!%p162_p10), %v824_v2  ;;  %s611_s21 = sshll.u32 (!%p162_p10), %s1134_s18, 4  ;;  %s1195_s26 = scalar_lea.hbm (!%p162_p10), %s1256_s3, %s737_s19  ;;  %s1197_s21 = int_to_ptr.vmem [resolvable:$true] %s611_s21 }
  0x12   : > { %827 = vmatpush3.bf16.msra.mxu0 (!%p162_p10), %v824_v2  ;;  %829 = vmatpush3.bf16.msra.mxu1 (!%p162_p10), %v824_v2  ;;  %s1207_s27 = scalar_lea.sflag (!%p162_p10), [#allocation3], %s186_s8  ;;  %s887_s28 = scalar_lea.vmem (!%p162_p10), %s1197_s21, 4096 }
  0x13   : > { %p888_p12 = scmp.ne.s32.totalorder (!%p162_p10), %s1197_s21, %s887_s28  ;;  %s967_s29 = smov (!%p162_p10), [#allocation2]  }
  0x15   : > { %p889_p13 = pnand (!%p162_p10), %p888_p12, %p1030_p4 }
  0x16   : > { %s191_s30 = scalar_select %p190_p11, %s957_s15, 1 }
  0x17   : > { %p890_p0 = pneg %p889_p13 }
  0x18   : > { %s736_s4 = sshll.u32 %s191_s30, 8  ;;  %s891_s30 = sshll.u32 %s967_s29, 4  ;;  %s892_s30 = int_to_ptr.vmem [resolvable:$false] %s891_s30 }
  0x19   : > { %s1056_s7 = scalar_lea.vmem %s1253_s0, %s736_s4  ;;  %s893_s4 = scalar_lea.vmem %s892_s30, 8192 }
  0x1a   : > { %v200_v3 = vld [vmem:[%s1056_s7] sm:$0xff]  ;;  %v201_v5 = vld [vmem:[%s1056_s7 + $0x8] sm:$0xff]  ;;  %v202_v7 = vld [vmem:[%s1056_s7 + $0x10] sm:$0xff]  ;;  %p894_p1 = scmp.lt.s32.totalorder %s1197_s21, %s892_s30  ;;  %p895_p2 = scmp.lt.s32.totalorder %s893_s4, %s887_s28 }
  0x1b   : > { %v216_v4 = vld [vmem:[%s1056_s7 + $0x80] sm:$0xff]  ;;  %776 = vmatprep.mubr.msk.f32.mxu0 %vm241_vm0, %v200_v3  ;;  %v217_v6 = vld [vmem:[%s1056_s7 + $0x88] sm:$0xff]  ;;  %v218_v8 = vld [vmem:[%s1056_s7 + $0x90] sm:$0xff] }
  0x1c   : > { %800 = vmatprep.mubr.msk.f32.mxu1 %vm241_vm0, %v216_v4  ;;  %777 = vmatmul.mubr.msk.f32.vlgmr.msra.gmra.mrb[0].mxu0 %vm241_vm0, %v201_v5  ;;  %v203_v9 = vld [vmem:[%s1056_s7 + $0x18] sm:$0xff]  ;;  %v204_v11 = vld [vmem:[%s1056_s7 + $0x20] sm:$0xff]  ;;  %v205_v13 = vld [vmem:[%s1056_s7 + $0x28] sm:$0xff]  ;;  %p896_p3 = por %p895_p2, %p894_p1 }
  0x1d   : > { %801 = vmatmul.mubr.msk.f32.vlgmr.msra.gmra.mrb[0].mxu1 %vm241_vm0, %v217_v6  ;;  %779 = vmatprep.mubr.msk.f32.mxu0 %vm241_vm0, %v202_v7  ;;  %v219_v10 = vld [vmem:[%s1056_s7 + $0x98] sm:$0xff]  ;;  %v220_v12 = vld [vmem:[%s1056_s7 + $0xa0] sm:$0xff]  ;;  %v221_v14 = vld [vmem:[%s1056_s7 + $0xa8] sm:$0xff] }
  0x1e   : > { %803 = vmatprep.mubr.msk.f32.mxu1 %vm241_vm0, %v218_v8  ;;  %v206_v15 = vld [vmem:[%s1056_s7 + $0x30] sm:$0xff]  ;;  %v207_v17 = vld [vmem:[%s1056_s7 + $0x38] sm:$0xff]  ;;  %v208_v19 = vld [vmem:[%s1056_s7 + $0x40] sm:$0xff]  ;;  %p897_p5 = pnand %p896_p3, %p890_p0 }
  0x1f   : > { %v222_v16 = vld [vmem:[%s1056_s7 + $0xb0] sm:$0xff]  ;;  %v223_v18 = vld [vmem:[%s1056_s7 + $0xb8] sm:$0xff]  ;;  %v224_v20 = vld [vmem:[%s1056_s7 + $0xc0] sm:$0xff] }
  0x20   : > { %780 = vmatmul.mubr.msk.f32.gmra.mrb[2].mxu0 %vm241_vm0, %v203_v9  ;;  %v209_v21 = vld [vmem:[%s1056_s7 + $0x48] sm:$0xff]  ;;  %v210_v23 = vld [vmem:[%s1056_s7 + $0x50] sm:$0xff]  ;;  %v211_v25 = vld [vmem:[%s1056_s7 + $0x58] sm:$0xff] }
  0x21   : > { %804 = vmatmul.mubr.msk.f32.gmra.mrb[2].mxu1 %vm241_vm0, %v219_v10  ;;  %782 = vmatprep.mubr.msk.f32.mxu0 %vm241_vm0, %v204_v11  ;;  %v225_v22 = vld [vmem:[%s1056_s7 + $0xc8] sm:$0xff]  ;;  %v226_v24 = vld [vmem:[%s1056_s7 + $0xd0] sm:$0xff]  ;;  %v227_v26 = vld [vmem:[%s1056_s7 + $0xd8] sm:$0xff] }
  0x22   : > { %806 = vmatprep.mubr.msk.f32.mxu1 %vm241_vm0, %v220_v12  ;;  %v212_v27 = vld [vmem:[%s1056_s7 + $0x60] sm:$0xff]  ;;  %v213_v29 = vld [vmem:[%s1056_s7 + $0x68] sm:$0xff]  ;;  %v214_v31 = vld [vmem:[%s1056_s7 + $0x70] sm:$0xff] }
  0x23   : > { %v228_v28 = vld [vmem:[%s1056_s7 + $0xe0] sm:$0xff]  ;;  %v229_v30 = vld [vmem:[%s1056_s7 + $0xe8] sm:$0xff]  ;;  %v230_v32 = vld [vmem:[%s1056_s7 + $0xf0] sm:$0xff] }
  0x24   : > { %783 = vmatmul.mubr.msk.f32.gmra.mrb[4].mxu0 %vm241_vm0, %v205_v13  ;;  %v215_v33 = vld [vmem:[%s1056_s7 + $0x78] sm:$0xff] }
  0x25   : > { %807 = vmatmul.mubr.msk.f32.gmra.mrb[4].mxu1 %vm241_vm0, %v221_v14  ;;  %785 = vmatprep.mubr.msk.f32.mxu0 %vm241_vm0, %v206_v15  ;;  %v231_v34 = vld [vmem:[%s1056_s7 + $0xf8] sm:$0xff] }
  0x26   : > { %809 = vmatprep.mubr.msk.f32.mxu1 %vm241_vm0, %v222_v16 }
  0x28   : > { %786 = vmatmul.mubr.msk.f32.gmra.mrb[6].mxu0 %vm241_vm0, %v207_v17 }
  0x29   : > { %810 = vmatmul.mubr.msk.f32.gmra.mrb[6].mxu1 %vm241_vm0, %v223_v18  ;;  %788 = vmatprep.mubr.msk.f32.mxu0 %vm241_vm0, %v208_v19 }
  0x2a   : > { %812 = vmatprep.mubr.msk.f32.mxu1 %vm241_vm0, %v224_v20 }
  0x2c   : > { %789 = vmatmul.mubr.msk.f32.gmra.mrb[8].mxu0 %vm241_vm0, %v209_v21 }
  0x2d   : > { %813 = vmatmul.mubr.msk.f32.gmra.mrb[8].mxu1 %vm241_vm0, %v225_v22  ;;  %791 = vmatprep.mubr.msk.f32.mxu0 %vm241_vm0, %v210_v23 }
  0x2e   : > { %815 = vmatprep.mubr.msk.f32.mxu1 %vm241_vm0, %v226_v24 }
  0x30   : > { %792 = vmatmul.mubr.msk.f32.gmra.mrb[10].mxu0 %vm241_vm0, %v211_v25 }
  0x31   : > { %816 = vmatmul.mubr.msk.f32.gmra.mrb[10].mxu1 %vm241_vm0, %v227_v26  ;;  %794 = vmatprep.mubr.msk.f32.mxu0 %vm241_vm0, %v212_v27 }
  0x32   : > { %818 = vmatprep.mubr.msk.f32.mxu1 %vm241_vm0, %v228_v28 }
  0x34   : > { %795 = vmatmul.mubr.msk.f32.gmra.mrb[12].mxu0 %vm241_vm0, %v213_v29 }
  0x35   : > { %819 = vmatmul.mubr.msk.f32.gmra.mrb[12].mxu1 %vm241_vm0, %v229_v30  ;;  %797 = vmatprep.mubr.msk.f32.mxu0 %vm241_vm0, %v214_v31 }
  0x36   : > { %821 = vmatprep.mubr.msk.f32.mxu1 %vm241_vm0, %v230_v32 }
  0x38   : > { %798 = vmatmul.mubr.msk.f32.gmra.mrb[14].mxu0 %vm241_vm0, %v215_v33 }
  0x39   : > { %822 = vmatmul.mubr.msk.f32.gmra.mrb[14].mxu1 %vm241_vm0, %v231_v34 }
  0xef   : > { %v778_v36 = vpop.f32.mrb[0].mxu0 }
  0xf0   : > { %v802_v37 = vpop.f32.mrb[0].mxu1  ;;  %v410_v38 = vadd.f32 %v778_v36, %v1128_v35  ;;  %v404_v40 = vpop.f32.mrb[1].mxu0 }
  0xf1   : > { %v490_v39 = vadd.f32 %v802_v37, %v1128_v35  ;;  %v484_v41 = vpop.f32.mrb[1].mxu1  ;;  %v405_v42 = vadd.f32 %v1128_v35, %v404_v40 }
  0xf2   : > { %v485_v43 = vadd.f32 %v1128_v35, %v484_v41  ;;  %564 = vst [vmem:[%s1134_s18 + $0x8] sm:$0xff] %v410_v38 }
  0xf3   : > { %580 = vst [vmem:[%s1134_s18 + $0x88] sm:$0xff] %v490_v39  ;;  %563 = vst [vmem:[%s1134_s18] sm:$0xff] %v405_v42  ;;  %v781_v44 = vpop.f32.mrb[2].mxu0 }
  0xf4   : > { %579 = vst [vmem:[%s1134_s18 + $0x80] sm:$0xff] %v485_v43  ;;  %v805_v45 = vpop.f32.mrb[2].mxu1  ;;  %v420_v46 = vadd.f32 %v781_v44, %v1128_v35  ;;  %v414_v48 = vpop.f32.mrb[3].mxu0 }
  0xf5   : > { %v500_v47 = vadd.f32 %v805_v45, %v1128_v35  ;;  %v494_v49 = vpop.f32.mrb[3].mxu1  ;;  %v415_v50 = vadd.f32 %v1128_v35, %v414_v48 }
  0xf6   : > { %v495_v51 = vadd.f32 %v1128_v35, %v494_v49  ;;  %566 = vst [vmem:[%s1134_s18 + $0x18] sm:$0xff] %v420_v46 }
  0xf7   : > { %582 = vst [vmem:[%s1134_s18 + $0x98] sm:$0xff] %v500_v47  ;;  %565 = vst [vmem:[%s1134_s18 + $0x10] sm:$0xff] %v415_v50  ;;  %v784_v52 = vpop.f32.mrb[4].mxu0 }
  0xf8   : > { %581 = vst [vmem:[%s1134_s18 + $0x90] sm:$0xff] %v495_v51  ;;  %v808_v53 = vpop.f32.mrb[4].mxu1  ;;  %v430_v54 = vadd.f32 %v784_v52, %v1128_v35  ;;  %v424_v56 = vpop.f32.mrb[5].mxu0 }
  0xf9   : > { %v510_v55 = vadd.f32 %v808_v53, %v1128_v35  ;;  %v504_v57 = vpop.f32.mrb[5].mxu1  ;;  %v425_v58 = vadd.f32 %v1128_v35, %v424_v56 }
  0xfa   : > { %v505_v59 = vadd.f32 %v1128_v35, %v504_v57  ;;  %568 = vst [vmem:[%s1134_s18 + $0x28] sm:$0xff] %v430_v54 }
  0xfb   : > { %584 = vst [vmem:[%s1134_s18 + $0xa8] sm:$0xff] %v510_v55  ;;  %567 = vst [vmem:[%s1134_s18 + $0x20] sm:$0xff] %v425_v58  ;;  %v787_v60 = vpop.f32.mrb[6].mxu0 }
  0xfc   : > { %583 = vst [vmem:[%s1134_s18 + $0xa0] sm:$0xff] %v505_v59  ;;  %v811_v61 = vpop.f32.mrb[6].mxu1  ;;  %v440_v62 = vadd.f32 %v787_v60, %v1128_v35  ;;  %v434_v0 = vpop.f32.mrb[7].mxu0 }
  0xfd   : > { %v520_v63 = vadd.f32 %v811_v61, %v1128_v35  ;;  %v514_v1 = vpop.f32.mrb[7].mxu1  ;;  %v435_v2 = vadd.f32 %v1128_v35, %v434_v0 }
  0xfe   : > { %v515_v3 = vadd.f32 %v1128_v35, %v514_v1  ;;  %570 = vst [vmem:[%s1134_s18 + $0x38] sm:$0xff] %v440_v62 }
  0xff   : > { %586 = vst [vmem:[%s1134_s18 + $0xb8] sm:$0xff] %v520_v63  ;;  %569 = vst [vmem:[%s1134_s18 + $0x30] sm:$0xff] %v435_v2  ;;  %v790_v4 = vpop.f32.mrb[8].mxu0 }
 0x100   : > { %585 = vst [vmem:[%s1134_s18 + $0xb0] sm:$0xff] %v515_v3  ;;  %v814_v5 = vpop.f32.mrb[8].mxu1  ;;  %v450_v6 = vadd.f32 %v790_v4, %v1128_v35  ;;  %v444_v8 = vpop.f32.mrb[9].mxu0 }
 0x101   : > { %v530_v7 = vadd.f32 %v814_v5, %v1128_v35  ;;  %v524_v9 = vpop.f32.mrb[9].mxu1  ;;  %v445_v10 = vadd.f32 %v1128_v35, %v444_v8 }
 0x102   : > { %v525_v11 = vadd.f32 %v1128_v35, %v524_v9  ;;  %572 = vst [vmem:[%s1134_s18 + $0x48] sm:$0xff] %v450_v6 }
 0x103   : > { %588 = vst [vmem:[%s1134_s18 + $0xc8] sm:$0xff] %v530_v7  ;;  %571 = vst [vmem:[%s1134_s18 + $0x40] sm:$0xff] %v445_v10  ;;  %v793_v12 = vpop.f32.mrb[10].mxu0 }
 0x104   : > { %587 = vst [vmem:[%s1134_s18 + $0xc0] sm:$0xff] %v525_v11  ;;  %v817_v13 = vpop.f32.mrb[10].mxu1  ;;  %v460_v14 = vadd.f32 %v793_v12, %v1128_v35  ;;  %v454_v16 = vpop.f32.mrb[11].mxu0 }
 0x105   : > { %v540_v15 = vadd.f32 %v817_v13, %v1128_v35  ;;  %v534_v17 = vpop.f32.mrb[11].mxu1  ;;  %v455_v18 = vadd.f32 %v1128_v35, %v454_v16 }
 0x106   : > { %v535_v19 = vadd.f32 %v1128_v35, %v534_v17  ;;  %574 = vst [vmem:[%s1134_s18 + $0x58] sm:$0xff] %v460_v14 }
 0x107   : > { %590 = vst [vmem:[%s1134_s18 + $0xd8] sm:$0xff] %v540_v15  ;;  %573 = vst [vmem:[%s1134_s18 + $0x50] sm:$0xff] %v455_v18  ;;  %v796_v20 = vpop.f32.mrb[12].mxu0 }
 0x108   : > { %589 = vst [vmem:[%s1134_s18 + $0xd0] sm:$0xff] %v535_v19  ;;  %v820_v21 = vpop.f32.mrb[12].mxu1  ;;  %v470_v22 = vadd.f32 %v796_v20, %v1128_v35  ;;  %v464_v24 = vpop.f32.mrb[13].mxu0 }
 0x109   : > { %v550_v23 = vadd.f32 %v820_v21, %v1128_v35  ;;  %v544_v25 = vpop.f32.mrb[13].mxu1  ;;  %v465_v26 = vadd.f32 %v1128_v35, %v464_v24 }
 0x10a   : > { %v545_v27 = vadd.f32 %v1128_v35, %v544_v25  ;;  %576 = vst [vmem:[%s1134_s18 + $0x68] sm:$0xff] %v470_v22 }
 0x10b   : > { %592 = vst [vmem:[%s1134_s18 + $0xe8] sm:$0xff] %v550_v23  ;;  %575 = vst [vmem:[%s1134_s18 + $0x60] sm:$0xff] %v465_v26  ;;  %v799_v28 = vpop.f32.mrb[14].mxu0 }
 0x10c   : > { %591 = vst [vmem:[%s1134_s18 + $0xe0] sm:$0xff] %v545_v27  ;;  %v823_v29 = vpop.f32.mrb[14].mxu1  ;;  %v480_v30 = vadd.f32 %v799_v28, %v1128_v35  ;;  %v474_v32 = vpop.f32.mrb[15].mxu0 }
 0x10d   : > { %v560_v31 = vadd.f32 %v823_v29, %v1128_v35  ;;  %v554_v33 = vpop.f32.mrb[15].mxu1  ;;  %v475_v34 = vadd.f32 %v1128_v35, %v474_v32 }
 0x10e   : > { %v555_v36 = vadd.f32 %v1128_v35, %v554_v33  ;;  %578 = vst [vmem:[%s1134_s18 + $0x78] sm:$0xff] %v480_v30 }
 0x10f   : > { %594 = vst [vmem:[%s1134_s18 + $0xf8] sm:$0xff] %v560_v31  ;;  %577 = vst [vmem:[%s1134_s18 + $0x70] sm:$0xff] %v475_v34 }
 0x110   : > { %593 = vst [vmem:[%s1134_s18 + $0xf0] sm:$0xff] %v555_v36 }
 0x111   : > { %900 = shalt.err (!%p897_p5)
}
 0x112   : > { %s901_s5 = scalar_lea.hbm %s1195_s26, 4096  ;;  %s905_s8 = scalar_lea.hbm %s1256_s3, 8192 }
 0x113   : > { %p902_p6 = scmp.ne.s32.totalorder %s1195_s26, %s901_s5  ;;  %p906_p10 = scmp.lt.u32.totalorder %s1195_s26, %s1256_s3 }
 0x114   : > { %p907_p11 = scmp.lt.u32.totalorder %s905_s8, %s901_s5  ;;  %p909_p13 = scmp.lt.u32.totalorder %s901_s5, %s1195_s26 }
 0x115   : > { %p903_p7 = pnand %p902_p6, %p1030_p4 }
 0x116   : > { %p908_p12 = por %p907_p11, %p906_p10 }
 0x117   : > { %p904_p9 = pneg %p903_p7 }
 0x118   : > { %p910_p0 = por %p909_p13, %p908_p12 }
 0x11a   : > { %p911_p1 = pnand %p910_p0, %p904_p9 }
 0x11c   : > { %914 = shalt.err (!%p911_p1)
}
 0x11d   : > { %s968_s11 = smov 128   ;;  %s969_s18 = smov 8  }
 0x11e   : > { %830 = dma.vmem_to_hbm [thread:$0]  (%p1030_p4), %s1197_s21, 4096, %s1195_s26, %s1207_s27, %s968_s11, %s968_s11, %s969_s18  }
 0x11f PF: > { %p836_p2 = scmp.ge.s32.totalorder %s965_s17, 2  ;;  %s626_s19 = sand.u32 1, %s945_s12  }
 0x120   : > { %s627_s15 = scalar_lea.sflag [#allocation3], %s626_s19 }
 0x121   : > { %p833_p3 = pnand %p836_p2, %p1037_p8 }
 0x123   : > { %940 = dma.done.wait (!%p833_p3), %s627_s15, 4096  }
 0x124   : > { %942 = vsyncadd (!%p833_p3), %s627_s15, 4294963200  ;;  %s16_s17 = sadd.s32 1, %s965_s17   ;;  %s1259_s12 = smov %s949_s13 }
 0x125   : > { %p13_p5 = scmp.ge.s32.totalorder %s16_s17, 4   ;;  %s1260_s13 = smov %s953_s14 }
 0x126   : > { %s1261_s14 = smov %s1043_s25  ;;  %s1262_s15 = smov %s961_s16 }
 0x127   : > { %s1263_s16 = smov %s1265_s20  ;;  %15 = sbr.rel (!%p13_p5) target bundleno = 4 (0x4), region = 67 }
 0x12e   :  { %632 = vsyncpa [#allocation3], 1 }
 0x12f   :  { %634 = vsyncpa [#allocation3 + $0x1], 1 }

</bundles_post_ra>
